<compile_context>
chip_gen: v7x
topology: tpu7x:2x2x1
jax: 0.10.0
libtpu: 0.0.40
codegen_flags: <defaults>
</compile_context>

<pallas_src>
import functools

import jax
import jax.numpy as jnp
from jax.experimental import pallas as pl
from jax.experimental.pallas import tpu as pltpu


def _leaky_relu(x, slope=0.2):
    return jnp.where(x > 0, x, slope * x)


# ------------------------------ fused kernel ---------------------------------
def _mhga_kernel(h_ref, w_big_ref, bias_ref, out_ref, *, n_head, f_out):
    gb, bs, f_in = h_ref.shape                  # graphs-per-block, nodes, features
    n_hp = n_head * f_out

    # ONE MXU push: h_prime for all heads + all src/dst attention logits.
    h2 = h_ref[...].reshape(gb * bs, f_in)                              # tile-aligned (bs=8 rows)
    z = jnp.dot(h2, w_big_ref[...], preferred_element_type=jnp.float32)  # (gb*bs, n_hp + 2H)
    z = z.reshape(gb, bs, n_hp + 2 * n_head)

    hp_all = z[..., :n_hp]                       # (gb, bs, n_head*f_out)
    src_all = z[..., n_hp:n_hp + n_head]         # (gb, bs, n_head)
    dst_all = z[..., n_hp + n_head:]             # (gb, bs, n_head)
    # one transpose for ALL heads (instead of one per head)
    dst_t = jnp.transpose(dst_all, (0, 2, 1))    # (gb, n_head, bs)

    outs = []
    # n_head is a small static constant -> unrolled loop inside one invocation.
    for hd in range(n_head):
        hp = hp_all[..., hd * f_out:(hd + 1) * f_out]          # (gb, bs, f_out)
        # attn[g, i, j] = src[g, i] + dst[g, j]
        attn = src_all[..., hd:hd + 1] + dst_t[:, hd:hd + 1, :]  # (gb, bs, bs)
        attn = _leaky_relu(attn)

        # softmax over the last axis (max shift: logits are unbounded)
        m = jnp.max(attn, axis=-1, keepdims=True)
        e = jnp.exp(attn - m)
        denom = jnp.sum(e, axis=-1, keepdims=True)
        r = pl.reciprocal(denom, approx=True)          # EUP vrcp (free slot)
        r = r * (2.0 - denom * r)                      # one Newton-Raphson step -> ~1e-7 rel err
        p = e * r
        # TODO(synk): attention dropout is identity (eval-mode semantics).

        outs.append(jnp.einsum("gij,gjo->gio", p, hp,
                               preferred_element_type=jnp.float32))    # (gb, bs, f_out)

    # single full-width (lane-dense) store; bias pre-tiled and added once
    out_ref[...] = jnp.concatenate(outs, axis=-1) + bias_ref[...]


# --------------------------- parameter re-layout ------------------------------
def prepare_params(w, a_src, a_dst, bias):
    """One-time parameter re-layout (hoisted out of the forward path)."""
    n_head, f_in, f_out = w.shape
    # columns [hd*f_out:(hd+1)*f_out] of w_all == w[hd]  (matches torch head concat)
    w_all = jnp.transpose(w, (1, 0, 2)).reshape(f_in, n_head * f_out)
    # fold the attention projections into the main matmul:
    #   column hd of wa_src == w[hd] @ a_src[hd]
    hi = jax.lax.Precision.HIGHEST   # one-time fold; keep it exact so h@(W a) ~= (h W)@a
    wa_src = jnp.einsum("hfo,hox->fh", w, a_src, precision=hi)   # (f_in, n_head)
    wa_dst = jnp.einsum("hfo,hox->fh", w, a_dst, precision=hi)   # (f_in, n_head)
    w_big = jnp.concatenate([w_all, wa_src, wa_dst], axis=1)     # (f_in, n_head*f_out + 2*n_head)
    bias_all = jnp.tile(bias.reshape(1, f_out), (1, n_head))     # (1, n_head*f_out)
    return w_big, bias_all


# -------------------------------- wrappers -------------------------------------
@functools.partial(jax.jit, static_argnames=("n_head", "f_out", "graphs_per_block"))
def mhga_forward_batched(h, w_big, bias_all, *, n_head, f_out, graphs_per_block):
    """h: (n_graphs, bs, f_in) independent graphs / TCN timesteps -> (n_graphs, bs, n_head*f_out)."""
    n_graphs, bs, f_in = h.shape
    gb = min(graphs_per_block, n_graphs)
    assert n_graphs % gb == 0, (n_graphs, gb)
    n_cols = w_big.shape[1]
    kernel = functools.partial(_mhga_kernel, n_head=n_head, f_out=f_out)
    return pl.pallas_call(
        kernel,
        out_shape=jax.ShapeDtypeStruct((n_graphs, bs, n_head * f_out), jnp.float32),
        grid=(n_graphs // gb,),
        in_specs=[
            pl.BlockSpec((gb, bs, f_in), lambda g: (g, 0, 0)),          # graphs tiled over grid
            pl.BlockSpec((f_in, n_cols), lambda g: (0, 0)),             # grid-invariant weights
            pl.BlockSpec((1, n_head * f_out), lambda g: (0, 0)),        # grid-invariant bias
        ],
        out_specs=pl.BlockSpec((gb, bs, n_head * f_out), lambda g: (g, 0, 0)),
        # parallel axis: shards across both TensorCores on v7x, harmless on v5e/v6e
        compiler_params=pltpu.CompilerParams(dimension_semantics=("parallel",)),
    )(h, w_big, bias_all)


def mhga_forward(h, w_big, bias_all, *, n_head, f_out):
    """Exact module interface: h is (bs, f_in) for one graph -> (bs, n_head*f_out)."""
    return mhga_forward_batched(h[None], w_big, bias_all,
                                n_head=n_head, f_out=f_out, graphs_per_block=1)[0]


# ------------------------- pure-JAX reference (torch) -------------------------
def mhga_reference(h, w, a_src, a_dst, bias):
    bs = h.shape[0]
    hp = jnp.einsum("bf,hfo->hbo", h, w)                    # (n_head, bs, f_out)
    src = jnp.einsum("hbo,hoi->hbi", hp, a_src)[..., 0]     # (n_head, bs)
    dst = jnp.einsum("hbo,hoi->hbi", hp, a_dst)[..., 0]     # (n_head, bs)
    attn = _leaky_relu(src[:, :, None] + dst[:, None, :])   # (n_head, bs, bs)
    attn = jax.nn.softmax(attn, axis=-1)
    out = jnp.einsum("hij,hjo->hio", attn, hp) + bias[None, None, :]
    return jnp.transpose(out, (1, 0, 2)).reshape(bs, -1)    # (bs, n_head*f_out)


def _xavier_uniform(key, shape, gain=1.414):
    fan_in, fan_out = shape[-2], shape[-1]
    bound = gain * (6.0 / (fan_in + fan_out)) ** 0.5
    return jax.random.uniform(key, shape, jnp.float32, -bound, bound)


if __name__ == "__main__":
    bs, f_in, f_out, n_head = 8, 32, 16, 4
    n_graphs = 16            # independent graphs / TCN timesteps batched through one call
    graphs_per_block = 8     # 64 MXU rows per grid step

    key = jax.random.PRNGKey(0)
    kh, kw, ks, kd, kb = jax.random.split(key, 5)
    h_batch = jax.random.normal(kh, (n_graphs, bs, f_in), jnp.float32)
    w = _xavier_uniform(kw, (n_head, f_in, f_out))
    a_src = _xavier_uniform(ks, (n_head, f_out, 1))
    a_dst = _xavier_uniform(kd, (n_head, f_out, 1))
    bias = 0.01 * jax.random.normal(kb, (f_out,), jnp.float32)  # spec inits to 0; nonzero exercises the add

    w_big, bias_all = prepare_params(w, a_src, a_dst, bias)

    # 1) exact module interface (single graph)
    out1 = jax.block_until_ready(
        mhga_forward(h_batch[0], w_big, bias_all, n_head=n_head, f_out=f_out))
    ref1 = jax.block_until_ready(mhga_reference(h_batch[0], w, a_src, a_dst, bias))
    assert out1.shape == (bs, n_head * f_out), out1.shape
    assert jnp.allclose(out1, ref1, rtol=1e-4, atol=1e-4), (
        float(jnp.max(jnp.abs(out1 - ref1))))

    # 2) batched graphs/timesteps through one pallas_call with a parallel grid axis
    out_b = jax.block_until_ready(
        mhga_forward_batched(h_batch, w_big, bias_all,
                             n_head=n_head, f_out=f_out,
                             graphs_per_block=graphs_per_block))
    ref_b = jax.block_until_ready(
        jax.vmap(lambda hh: mhga_reference(hh, w, a_src, a_dst, bias))(h_batch))
    assert out_b.shape == (n_graphs, bs, n_head * f_out), out_b.shape
    assert jnp.allclose(out_b, ref_b, rtol=1e-4, atol=1e-4), (
        float(jnp.max(jnp.abs(out_b - ref_b))))

    print("KERNEL_OK")
</pallas_src>

<mosaic_0001>
module attributes {stable_mosaic.version = 11 : i64} {
  func.func @_mhga_kernel(%arg0: i32, %arg1: memref<1x8x32xf32, #tpu.memory_space<vmem>>, %arg2: memref<32x72xf32, #tpu.memory_space<vmem>>, %arg3: memref<1x64xf32, #tpu.memory_space<vmem>>, %arg4: memref<1x8x64xf32, #tpu.memory_space<vmem>>) attributes {dimension_semantics = [#tpu.dimension_semantics<parallel>], iteration_bounds = array<i64: 1>, scalar_prefetch = 0 : i64, scratch_operands = 0 : i64, tpu.core_type = #tpu.core_type<tc>, window_params = [{transform_indices = @transform_0, window_bounds = array<i64: 1, 8, 32>}, {pipeline_mode = #tpu.pipeline_mode<synchronous>, transform_indices = @transform_1, window_bounds = array<i64: 32, 72>}, {pipeline_mode = #tpu.pipeline_mode<synchronous>, transform_indices = @transform_2, window_bounds = array<i64: 1, 64>}, {transform_indices = @transform_3, window_bounds = array<i64: 1, 8, 64>}]} {
    %c0 = arith.constant 0 : index
    %c0_0 = arith.constant 0 : index
    %c0_1 = arith.constant 0 : index
    %0 = vector.load %arg1[%c0, %c0_0, %c0_1] : memref<1x8x32xf32, #tpu.memory_space<vmem>>, vector<1x8x32xf32>
    %1 = vector.shape_cast %0 : vector<1x8x32xf32> to vector<8x32xf32>
    %c0_2 = arith.constant 0 : index
    %c0_3 = arith.constant 0 : index
    %2 = vector.load %arg2[%c0_2, %c0_3] : memref<32x72xf32, #tpu.memory_space<vmem>>, vector<32x72xf32>
    %cst = arith.constant dense<0.000000e+00> : vector<8x72xf32>
    %3 = tpu.matmul %1, %2, %cst {dimension_numbers = #tpu.dot_dimension_numbers<[1], [0], [0], [1], [0, 0, 1, 1], [], []>} : vector<8x32xf32>, vector<32x72xf32>, vector<8x72xf32> -> vector<8x72xf32>
    %4 = vector.shape_cast %3 : vector<8x72xf32> to vector<1x8x72xf32>
    %5 = vector.extract_strided_slice %4 {offsets = [0, 0, 0], sizes = [1, 8, 64], strides = [1, 1, 1]} : vector<1x8x72xf32> to vector<1x8x64xf32>
    %6 = vector.extract_strided_slice %4 {offsets = [0, 0, 64], sizes = [1, 8, 4], strides = [1, 1, 1]} : vector<1x8x72xf32> to vector<1x8x4xf32>
    %7 = vector.extract_strided_slice %4 {offsets = [0, 0, 68], sizes = [1, 8, 4], strides = [1, 1, 1]} : vector<1x8x72xf32> to vector<1x8x4xf32>
    %8 = tpu.transpose %7, [0, 2, 1] : vector<1x8x4xf32> -> vector<1x4x8xf32>
    %9 = vector.extract_strided_slice %5 {offsets = [0, 0, 0], sizes = [1, 8, 16], strides = [1, 1, 1]} : vector<1x8x64xf32> to vector<1x8x16xf32>
    %10 = vector.extract_strided_slice %6 {offsets = [0, 0, 0], sizes = [1, 8, 1], strides = [1, 1, 1]} : vector<1x8x4xf32> to vector<1x8x1xf32>
    %11 = vector.extract_strided_slice %8 {offsets = [0, 0, 0], sizes = [1, 1, 8], strides = [1, 1, 1]} : vector<1x4x8xf32> to vector<1x1x8xf32>
    %12 = vector.broadcast %10 : vector<1x8x1xf32> to vector<1x8x8xf32>
    %13 = vector.broadcast %11 : vector<1x1x8xf32> to vector<1x8x8xf32>
    %14 = arith.addf %12, %13 : vector<1x8x8xf32>
    %cst_4 = arith.constant 0.000000e+00 : f32
    %15 = vector.broadcast %cst_4 : f32 to vector<1x8x8xf32>
    %16 = arith.cmpf ogt, %14, %15 : vector<1x8x8xf32>
    %cst_5 = arith.constant 2.000000e-01 : f32
    %17 = vector.broadcast %cst_5 : f32 to vector<1x8x8xf32>
    %18 = arith.mulf %17, %14 : vector<1x8x8xf32>
    %19 = arith.select %16, %14, %18 : vector<1x8x8xi1>, vector<1x8x8xf32>
    %cst_6 = arith.constant dense<0xFF800000> : vector<1x8xf32>
    %20 = vector.multi_reduction <maximumf>, %19, %cst_6 [2] : vector<1x8x8xf32> to vector<1x8xf32>
    %21 = vector.shape_cast %20 : vector<1x8xf32> to vector<1x8x1xf32>
    %22 = vector.broadcast %21 : vector<1x8x1xf32> to vector<1x8x8xf32>
    %23 = arith.subf %19, %22 : vector<1x8x8xf32>
    %24 = math.exp %23 : vector<1x8x8xf32>
    %cst_7 = arith.constant dense<0.000000e+00> : vector<1x8xf32>
    %25 = vector.multi_reduction <add>, %24, %cst_7 [2] : vector<1x8x8xf32> to vector<1x8xf32>
    %26 = vector.shape_cast %25 : vector<1x8xf32> to vector<1x8x1xf32>
    %27 = tpu.reciprocal %26 {approx = true} : vector<1x8x1xf32> -> vector<1x8x1xf32>
    %28 = arith.mulf %26, %27 : vector<1x8x1xf32>
    %cst_8 = arith.constant 2.000000e+00 : f32
    %29 = vector.broadcast %cst_8 : f32 to vector<1x8x1xf32>
    %30 = arith.subf %29, %28 : vector<1x8x1xf32>
    %31 = arith.mulf %27, %30 : vector<1x8x1xf32>
    %32 = vector.broadcast %31 : vector<1x8x1xf32> to vector<1x8x8xf32>
    %33 = arith.mulf %24, %32 : vector<1x8x8xf32>
    "tpu.trace_start"() <{level = 10 : i32, message = "gij,gjo->gio"}> : () -> ()
    %cst_9 = arith.constant dense<0.000000e+00> : vector<1x8x16xf32>
    %34 = tpu.matmul %33, %9, %cst_9 {dimension_numbers = #tpu.dot_dimension_numbers<[2], [1], [1], [2], [0, 0, 0, 1, 1, 2], [0], [0]>} : vector<1x8x8xf32>, vector<1x8x16xf32>, vector<1x8x16xf32> -> vector<1x8x16xf32>
    "tpu.trace_stop"() : () -> ()
    %35 = vector.extract_strided_slice %5 {offsets = [0, 0, 16], sizes = [1, 8, 16], strides = [1, 1, 1]} : vector<1x8x64xf32> to vector<1x8x16xf32>
    %36 = vector.extract_strided_slice %6 {offsets = [0, 0, 1], sizes = [1, 8, 1], strides = [1, 1, 1]} : vector<1x8x4xf32> to vector<1x8x1xf32>
    %37 = vector.extract_strided_slice %8 {offsets = [0, 1, 0], sizes = [1, 1, 8], strides = [1, 1, 1]} : vector<1x4x8xf32> to vector<1x1x8xf32>
    %38 = vector.broadcast %36 : vector<1x8x1xf32> to vector<1x8x8xf32>
    %39 = vector.broadcast %37 : vector<1x1x8xf32> to vector<1x8x8xf32>
    %40 = arith.addf %38, %39 : vector<1x8x8xf32>
    %cst_10 = arith.constant 0.000000e+00 : f32
    %41 = vector.broadcast %cst_10 : f32 to vector<1x8x8xf32>
    %42 = arith.cmpf ogt, %40, %41 : vector<1x8x8xf32>
    %cst_11 = arith.constant 2.000000e-01 : f32
    %43 = vector.broadcast %cst_11 : f32 to vector<1x8x8xf32>
    %44 = arith.mulf %43, %40 : vector<1x8x8xf32>
    %45 = arith.select %42, %40, %44 : vector<1x8x8xi1>, vector<1x8x8xf32>
    %cst_12 = arith.constant dense<0xFF800000> : vector<1x8xf32>
    %46 = vector.multi_reduction <maximumf>, %45, %cst_12 [2] : vector<1x8x8xf32> to vector<1x8xf32>
    %47 = vector.shape_cast %46 : vector<1x8xf32> to vector<1x8x1xf32>
    %48 = vector.broadcast %47 : vector<1x8x1xf32> to vector<1x8x8xf32>
    %49 = arith.subf %45, %48 : vector<1x8x8xf32>
    %50 = math.exp %49 : vector<1x8x8xf32>
    %cst_13 = arith.constant dense<0.000000e+00> : vector<1x8xf32>
    %51 = vector.multi_reduction <add>, %50, %cst_13 [2] : vector<1x8x8xf32> to vector<1x8xf32>
    %52 = vector.shape_cast %51 : vector<1x8xf32> to vector<1x8x1xf32>
    %53 = tpu.reciprocal %52 {approx = true} : vector<1x8x1xf32> -> vector<1x8x1xf32>
    %54 = arith.mulf %52, %53 : vector<1x8x1xf32>
    %cst_14 = arith.constant 2.000000e+00 : f32
    %55 = vector.broadcast %cst_14 : f32 to vector<1x8x1xf32>
    %56 = arith.subf %55, %54 : vector<1x8x1xf32>
    %57 = arith.mulf %53, %56 : vector<1x8x1xf32>
    %58 = vector.broadcast %57 : vector<1x8x1xf32> to vector<1x8x8xf32>
    %59 = arith.mulf %50, %58 : vector<1x8x8xf32>
    "tpu.trace_start"() <{level = 10 : i32, message = "gij,gjo->gio"}> : () -> ()
    %cst_15 = arith.constant dense<0.000000e+00> : vector<1x8x16xf32>
    %60 = tpu.matmul %59, %35, %cst_15 {dimension_numbers = #tpu.dot_dimension_numbers<[2], [1], [1], [2], [0, 0, 0, 1, 1, 2], [0], [0]>} : vector<1x8x8xf32>, vector<1x8x16xf32>, vector<1x8x16xf32> -> vector<1x8x16xf32>
    "tpu.trace_stop"() : () -> ()
    %61 = vector.extract_strided_slice %5 {offsets = [0, 0, 32], sizes = [1, 8, 16], strides = [1, 1, 1]} : vector<1x8x64xf32> to vector<1x8x16xf32>
    %62 = vector.extract_strided_slice %6 {offsets = [0, 0, 2], sizes = [1, 8, 1], strides = [1, 1, 1]} : vector<1x8x4xf32> to vector<1x8x1xf32>
    %63 = vector.extract_strided_slice %8 {offsets = [0, 2, 0], sizes = [1, 1, 8], strides = [1, 1, 1]} : vector<1x4x8xf32> to vector<1x1x8xf32>
    %64 = vector.broadcast %62 : vector<1x8x1xf32> to vector<1x8x8xf32>
    %65 = vector.broadcast %63 : vector<1x1x8xf32> to vector<1x8x8xf32>
    %66 = arith.addf %64, %65 : vector<1x8x8xf32>
    %cst_16 = arith.constant 0.000000e+00 : f32
    %67 = vector.broadcast %cst_16 : f32 to vector<1x8x8xf32>
    %68 = arith.cmpf ogt, %66, %67 : vector<1x8x8xf32>
    %cst_17 = arith.constant 2.000000e-01 : f32
    %69 = vector.broadcast %cst_17 : f32 to vector<1x8x8xf32>
    %70 = arith.mulf %69, %66 : vector<1x8x8xf32>
    %71 = arith.select %68, %66, %70 : vector<1x8x8xi1>, vector<1x8x8xf32>
    %cst_18 = arith.constant dense<0xFF800000> : vector<1x8xf32>
    %72 = vector.multi_reduction <maximumf>, %71, %cst_18 [2] : vector<1x8x8xf32> to vector<1x8xf32>
    %73 = vector.shape_cast %72 : vector<1x8xf32> to vector<1x8x1xf32>
    %74 = vector.broadcast %73 : vector<1x8x1xf32> to vector<1x8x8xf32>
    %75 = arith.subf %71, %74 : vector<1x8x8xf32>
    %76 = math.exp %75 : vector<1x8x8xf32>
    %cst_19 = arith.constant dense<0.000000e+00> : vector<1x8xf32>
    %77 = vector.multi_reduction <add>, %76, %cst_19 [2] : vector<1x8x8xf32> to vector<1x8xf32>
    %78 = vector.shape_cast %77 : vector<1x8xf32> to vector<1x8x1xf32>
    %79 = tpu.reciprocal %78 {approx = true} : vector<1x8x1xf32> -> vector<1x8x1xf32>
    %80 = arith.mulf %78, %79 : vector<1x8x1xf32>
    %cst_20 = arith.constant 2.000000e+00 : f32
    %81 = vector.broadcast %cst_20 : f32 to vector<1x8x1xf32>
    %82 = arith.subf %81, %80 : vector<1x8x1xf32>
    %83 = arith.mulf %79, %82 : vector<1x8x1xf32>
    %84 = vector.broadcast %83 : vector<1x8x1xf32> to vector<1x8x8xf32>
    %85 = arith.mulf %76, %84 : vector<1x8x8xf32>
    "tpu.trace_start"() <{level = 10 : i32, message = "gij,gjo->gio"}> : () -> ()
    %cst_21 = arith.constant dense<0.000000e+00> : vector<1x8x16xf32>
    %86 = tpu.matmul %85, %61, %cst_21 {dimension_numbers = #tpu.dot_dimension_numbers<[2], [1], [1], [2], [0, 0, 0, 1, 1, 2], [0], [0]>} : vector<1x8x8xf32>, vector<1x8x16xf32>, vector<1x8x16xf32> -> vector<1x8x16xf32>
    "tpu.trace_stop"() : () -> ()
    %87 = vector.extract_strided_slice %5 {offsets = [0, 0, 48], sizes = [1, 8, 16], strides = [1, 1, 1]} : vector<1x8x64xf32> to vector<1x8x16xf32>
    %88 = vector.extract_strided_slice %6 {offsets = [0, 0, 3], sizes = [1, 8, 1], strides = [1, 1, 1]} : vector<1x8x4xf32> to vector<1x8x1xf32>
    %89 = vector.extract_strided_slice %8 {offsets = [0, 3, 0], sizes = [1, 1, 8], strides = [1, 1, 1]} : vector<1x4x8xf32> to vector<1x1x8xf32>
    %90 = vector.broadcast %88 : vector<1x8x1xf32> to vector<1x8x8xf32>
    %91 = vector.broadcast %89 : vector<1x1x8xf32> to vector<1x8x8xf32>
    %92 = arith.addf %90, %91 : vector<1x8x8xf32>
    %cst_22 = arith.constant 0.000000e+00 : f32
    %93 = vector.broadcast %cst_22 : f32 to vector<1x8x8xf32>
    %94 = arith.cmpf ogt, %92, %93 : vector<1x8x8xf32>
    %cst_23 = arith.constant 2.000000e-01 : f32
    %95 = vector.broadcast %cst_23 : f32 to vector<1x8x8xf32>
    %96 = arith.mulf %95, %92 : vector<1x8x8xf32>
    %97 = arith.select %94, %92, %96 : vector<1x8x8xi1>, vector<1x8x8xf32>
    %cst_24 = arith.constant dense<0xFF800000> : vector<1x8xf32>
    %98 = vector.multi_reduction <maximumf>, %97, %cst_24 [2] : vector<1x8x8xf32> to vector<1x8xf32>
    %99 = vector.shape_cast %98 : vector<1x8xf32> to vector<1x8x1xf32>
    %100 = vector.broadcast %99 : vector<1x8x1xf32> to vector<1x8x8xf32>
    %101 = arith.subf %97, %100 : vector<1x8x8xf32>
    %102 = math.exp %101 : vector<1x8x8xf32>
    %cst_25 = arith.constant dense<0.000000e+00> : vector<1x8xf32>
    %103 = vector.multi_reduction <add>, %102, %cst_25 [2] : vector<1x8x8xf32> to vector<1x8xf32>
    %104 = vector.shape_cast %103 : vector<1x8xf32> to vector<1x8x1xf32>
    %105 = tpu.reciprocal %104 {approx = true} : vector<1x8x1xf32> -> vector<1x8x1xf32>
    %106 = arith.mulf %104, %105 : vector<1x8x1xf32>
    %cst_26 = arith.constant 2.000000e+00 : f32
    %107 = vector.broadcast %cst_26 : f32 to vector<1x8x1xf32>
    %108 = arith.subf %107, %106 : vector<1x8x1xf32>
    %109 = arith.mulf %105, %108 : vector<1x8x1xf32>
    %110 = vector.broadcast %109 : vector<1x8x1xf32> to vector<1x8x8xf32>
    %111 = arith.mulf %102, %110 : vector<1x8x8xf32>
    "tpu.trace_start"() <{level = 10 : i32, message = "gij,gjo->gio"}> : () -> ()
    %cst_27 = arith.constant dense<0.000000e+00> : vector<1x8x16xf32>
    %112 = tpu.matmul %111, %87, %cst_27 {dimension_numbers = #tpu.dot_dimension_numbers<[2], [1], [1], [2], [0, 0, 0, 1, 1, 2], [0], [0]>} : vector<1x8x8xf32>, vector<1x8x16xf32>, vector<1x8x16xf32> -> vector<1x8x16xf32>
    "tpu.trace_stop"() : () -> ()
    %113 = tpu.concatenate %34, %60, %86, %112 in 2 : vector<1x8x16xf32>, vector<1x8x16xf32>, vector<1x8x16xf32>, vector<1x8x16xf32> -> vector<1x8x64xf32>
    %c0_28 = arith.constant 0 : index
    %c0_29 = arith.constant 0 : index
    %114 = vector.load %arg3[%c0_28, %c0_29] : memref<1x64xf32, #tpu.memory_space<vmem>>, vector<1x64xf32>
    %115 = vector.shape_cast %114 : vector<1x64xf32> to vector<1x1x64xf32>
    %116 = vector.broadcast %115 : vector<1x1x64xf32> to vector<1x8x64xf32>
    %117 = arith.addf %113, %116 : vector<1x8x64xf32>
    %c0_30 = arith.constant 0 : index
    %c0_31 = arith.constant 0 : index
    %c0_32 = arith.constant 0 : index
    %118 = vector.load %arg4[%c0_30, %c0_31, %c0_32] : memref<1x8x64xf32, #tpu.memory_space<vmem>>, vector<1x8x64xf32>
    tpu.vector_store %arg4[%c0_30, %c0_31, %c0_32], %117 {strides = array<i32>} : memref<1x8x64xf32, #tpu.memory_space<vmem>>, vector<1x8x64xf32>,
    return
  }
  func.func @transform_0(%arg0: i32) -> (i32, i32, i32) {
    %c0_i32 = arith.constant 0 : i32
    %c0_i32_0 = arith.constant 0 : i32
    %c0_i32_1 = arith.constant 0 : i32
    return %arg0, %c0_i32, %c0_i32_0 : i32, i32, i32
  }
  func.func @transform_1(%arg0: i32) -> (i32, i32) {
    %c0_i32 = arith.constant 0 : i32
    %c0_i32_0 = arith.constant 0 : i32
    %c0_i32_1 = arith.constant 0 : i32
    return %c0_i32, %c0_i32_0 : i32, i32
  }
  func.func @transform_2(%arg0: i32) -> (i32, i32) {
    %c0_i32 = arith.constant 0 : i32
    %c0_i32_0 = arith.constant 0 : i32
    %c0_i32_1 = arith.constant 0 : i32
    return %c0_i32, %c0_i32_0 : i32, i32
  }
  func.func @transform_3(%arg0: i32) -> (i32, i32, i32) {
    %c0_i32 = arith.constant 0 : i32
    %c0_i32_0 = arith.constant 0 : i32
    %c0_i32_1 = arith.constant 0 : i32
    return %arg0, %c0_i32, %c0_i32_0 : i32, i32, i32
  }
}

</mosaic_0001>

<bundles_post_ra>
// kernel: mhga_forward_batched.1
= control target key start
LH: loop header
LB: loop body
LE: loop exit
PB: predicated region body
PF: predicated region fallthrough
CT: control target
= control target key end

     0   :  { %8 = vsyncpa [#allocation3], 0  ;;  %s897_s0 = inlined_call_operand.hbm [shape: f32[1,8,32], index: 0, kind: input, shape index: {}]   ;;  %s898_s1 = inlined_call_operand.hbm [shape: f32[32,72], index: 1, kind: input, shape index: {}]   ;;  %s899_s2 = inlined_call_operand.vmem [shape: f32[1,64], index: 2, kind: input, shape index: {}]   ;;  %s900_s3 = inlined_call_operand.hbm [shape: f32[1,8,64], index: 3, kind: output, shape index: {}]  }
   0x1   :  { %9 = vsyncpa [#allocation6], 0 }
   0x2   :  { %10 = vsyncpa [#allocation4], 0  ;;  %s773_s12 = smov [#allocation2]   ;;  %s774_s14 = smov [#allocation5]  }
   0x3   :  { %s17_s13 = sshll.u32 %s773_s12, 4  ;;  %s26_s15 = sshll.u32 %s774_s14, 4  ;;  %s18_s13 = int_to_ptr.vmem [resolvable:$true] %s17_s13  ;;  %s812_s15 = int_to_ptr.vmem [resolvable:$true] %s26_s15 }
   0x4   :  { %s701_s18 = scalar_lea.hbm %s897_s0, 128 }
   0x5   :  { %p702_p0 = scmp.ne.s32.totalorder %s897_s0, %s701_s18  ;;  %p705_p1 = scmp.lt.u32.totalorder %s701_s18, %s897_s0 }
   0x7   :  { %p707_p2 = pnand %p705_p1, %p702_p0 }
   0x9   :  { %710 = shalt.err (!%p707_p2)
}
   0xa   :  { %s711_s23 = scalar_lea.vmem %s18_s13, 128  ;;  %p716_p4 = scmp.lt.s32.totalorder %s18_s13, %s18_s13 }
   0xb   :  { %p712_p3 = scmp.ne.s32.totalorder %s18_s13, %s711_s23  ;;  %p717_p5 = scmp.lt.s32.totalorder %s711_s23, %s711_s23 }
   0xd   :  { %p718_p6 = por %p717_p5, %p716_p4 }
   0xf   :  { %p719_p7 = pnand %p718_p6, %p712_p3 }
  0x11   :  { %722 = shalt.err (!%p719_p7)
}
  0x12   :  { %20 = dma.hbm_to_vmem [thread:$0]  %s897_s0, 128, %s18_s13, [#allocation3]  }
  0x13   :  { %s723_s28 = scalar_lea.hbm %s898_s1, 512 }
  0x14   :  { %p724_p8 = scmp.ne.s32.totalorder %s898_s1, %s723_s28  ;;  %p727_p9 = scmp.lt.u32.totalorder %s723_s28, %s898_s1 }
  0x16   :  { %p729_p10 = pnand %p727_p9, %p724_p8 }
  0x18   :  { %732 = shalt.err (!%p729_p10)
}
  0x19   :  { %s733_s6 = scalar_lea.vmem %s812_s15, 512  ;;  %p738_p12 = scmp.lt.s32.totalorder %s812_s15, %s812_s15 }
  0x1a   :  { %p734_p11 = scmp.ne.s32.totalorder %s812_s15, %s733_s6  ;;  %p739_p13 = scmp.lt.s32.totalorder %s733_s6, %s733_s6 }
  0x1c   :  { %p740_p0 = por %p739_p13, %p738_p12 }
  0x1e   :  { %p741_p1 = pnand %p740_p0, %p734_p11 }
  0x20   :  { %744 = shalt.err (!%p741_p1)
}
  0x21   :  { %s775_s0 = smov 128   ;;  %s776_s7 = smov 8  }
  0x22   :  { %32 = dma.hbm_to_vmem [thread:$0]  %s898_s1, 512, %s812_s15, [#allocation6], %s775_s0, %s775_s0, %s776_s7  }
  0x23   :  { %767 = dma.done.wait [#allocation3], 128  }
  0x24   :  { %768 = vsyncadd [#allocation3], 4294967168 }
  0x25   :  { %769 = dma.done.wait [#allocation6], 512  }
  0x26   :  { %770 = vsyncadd [#allocation6], 4294966784  ;;  %v777_v0 = vmov 0.0|0.0   ;;  %vm778_vm0 = vmmov 0   ;;  %v779_v1 = vmov 0.0   ;;  %v780_v2 = vmov 65  }
  0x27   :  { %655 = vmatprep.subr.bf16.mxu0 %v777_v0  ;;  %632 = vmatprep.mubr.msk.f32.mxu0 %vm778_vm0, %v779_v1  ;;  %v42_v3 = vld [vmem:[#allocation5] sm:$0xff]  ;;  %v43_v4 = vld [vmem:[#allocation5 + $0x8] sm:$0xff]  ;;  %v44_v5 = vld [vmem:[#allocation5 + $0x10] sm:$0xff]  ;;  %vm46_vm1 = vcmask 261120   ;;  %v781_v10 = vmov 64   ;;  %s782_s1 = smov 60   ;;  %v160_v16 = vlaneseq }
  0x28   :  { %681 = vset.pattern.permute.xlu1 %v780_v2  ;;  %635 = vmatprep.subr.mxu1 %v779_v1  ;;  %v656_v6 = vpack.c.bf16 %v43_v4, %v42_v3  ;;  %v45_v7 = vld [vmem:[#allocation5 + $0x18] sm:$0xff]  ;;  %v783_v13 = vmov 66   ;;  %v784_v14 = vmov 67   ;;  %vm168_vm2 = vcmask 64512   ;;  %s785_s10 = smov 96   ;;  %s786_s11 = smov 112  }
  0x29   :  { %637 = vmatprep.mubr.msk.f32.mxu1 %vm778_vm0, %v779_v1  ;;  %v659_v8 = vpack.c.bf16 %v45_v7, %v44_v5  ;;  %v41_v9 = vld [vmem:[#allocation2] sm:$0xff]  ;;  %680 = vset.pattern.permute.xlu0 %v781_v10  ;;  %v161_v18 = vshrl.u32 %v160_v16, 7  ;;  %s787_s12 = smov 80   ;;  %s788_s13 = smov 16   ;;  %vm574_vm7 = vcmask 130048   ;;  %vm577_vm8 = vcmask 392192  }
  0x2a   :  { %657 = vmatpush3.bf16.msra.mxu0 %v656_v6  ;;  %s789_s14 = smov 32   ;;  %s790_s15 = smov 48   ;;  %vm587_vm9 = vcmask 523264  }
  0x2b   :  { %658 = vmatprep.subr.bf16.mxu0 %v777_v0  ;;  %v162_v21 = vsub.s32 0, %v161_v18  ;;  %v262_v22 = vsub.s32 1, %v161_v18  ;;  %v364_v23 = vsub.s32 2, %v161_v18  ;;  %v466_v24 = vsub.s32 3, %v161_v18  ;;  %s791_s18 = smov [#allocation7]  }
  0x2c   :  { %s595_s19 = sshll.u32 %s791_s18, 4  ;;  %s596_s19 = int_to_ptr.vmem [resolvable:$true] %s595_s19 }
  0x2d   :  { %s745_s20 = scalar_lea.vmem %s596_s19, 128  ;;  %p750_p3 = scmp.lt.s32.totalorder %s596_s19, %s596_s19 }
  0x2e   :  { %660 = vmatpush3.bf16.msra.mxu0 %v659_v8  ;;  %p746_p2 = scmp.ne.s32.totalorder %s596_s19, %s745_s20  ;;  %p751_p4 = scmp.lt.s32.totalorder %s745_s20, %s745_s20 }
  0x2f   :  { %650 = vmatprep.subr.mxu0 %v779_v1 }
  0x30   :  { %p752_p5 = por %p751_p4, %p750_p3 }
  0x31   :  { %633 = vmatmul.mubr.msk.f32.vlgmr.msra.gmra.mrb[0].mxu0 %vm46_vm1, %v41_v9 }
  0x32   :  { %652 = vmatprep.mubr.msk.f32.mxu0 %vm778_vm0, %v779_v1  ;;  %p753_p6 = pnand %p752_p5, %p746_p2 }
 0x104   :  { %v852_v11 = vpop.f32.mrb[0].mxu0 }
 0x105   :  { %257 = vperm.xlu1 %681, %v852_v11   ;;  %121 = vrot.lane.b32.xlu0 %v852_v11, %s782_s1  ;;  %v634_v12 = vpop.f32.mrb[1].mxu0 }
 0x106   :  { %636 = vmatpush3.msra.mxu1 %v852_v11 }
 0x107   :  { %640 = vmatprep.subr.mxu1 %v779_v1 }
 0x109   :  { %682 = vset.pattern.permute.xlu1 %v783_v13  ;;  %157 = vperm.xlu0 %680, %v852_v11  }
 0x10a   :  { %359 = vperm.xlu1 %682, %v852_v11  }
 0x10e   :  { %683 = vset.pattern.permute.xlu1 %v784_v14 }
 0x10f   :  { %461 = vperm.xlu1 %683, %v852_v11  }
 0x177   :  { %v122_v15 = vpop.permute.xlu0 %121 }
 0x178   :  { %124 = vxpose.xlu0.b32.start.end [1/1] (short) (narrow) %v122_v15, 8 }
 0x184   :  { %v258_v17 = vpop.permute.xlu1 %257 }
 0x188   :  { %v158_v19 = vpop.permute.xlu0 %157 }
 0x189   :  { %v360_v20 = vpop.permute.xlu1 %359 }
 0x18e   :  { %v462_v30 = vpop.permute.xlu1 %461 }
 0x1a1   :  { %684 = vset.pattern.permute.xlu0 %v784_v14 }
 0x1f8   :  { %v140_v25 = vpop.trf.xlu0 }
 0x1f9   :  { %v163_v26 = vrot.slane %v140_v25, %v162_v21  ;;  %v263_v27 = vrot.slane %v140_v25, %v262_v22  ;;  %v365_v28 = vrot.slane %v140_v25, %v364_v23  ;;  %v467_v29 = vrot.slane %v140_v25, %v466_v24 }
 0x1fb   :  { %v264_v31 = vadd.f32 %v263_v27, %v258_v17  ;;  %v164_v32 = vadd.f32 %v163_v26, %v158_v19  ;;  %v366_v33 = vadd.f32 %v365_v28, %v360_v20  ;;  %v468_v34 = vadd.f32 %v467_v29, %v462_v30 }
 0x1fd   :  { %vm265_vm3 = vcmp.gt.f32.partialorder %v264_v31, 0.0  ;;  %v266_v35 = vmul.f32 0.2, %v264_v31  ;;  %vm165_vm4 = vcmp.gt.f32.partialorder %v164_v32, 0.0  ;;  %v166_v36 = vmul.f32 0.2, %v164_v32 }
 0x1fe   :  { %vm367_vm5 = vcmp.gt.f32.partialorder %v366_v33, 0.0  ;;  %v368_v37 = vmul.f32 0.2, %v366_v33  ;;  %v470_v43 = vmul.f32 0.2, %v468_v34  ;;  %vm469_vm6 = vcmp.gt.f32.partialorder %v468_v34, 0.0 }
 0x1ff   :  { %v267_v38 = vsel %vm265_vm3, %v264_v31, %v266_v35  ;;  %v167_v39 = vsel %vm165_vm4, %v164_v32, %v166_v36 }
 0x200   :  { %v268_v40 = vsel %vm168_vm2, %v267_v38, -inf  ;;  %v169_v41 = vsel %vm168_vm2, %v167_v39, -inf  ;;  %v369_v42 = vsel %vm367_vm5, %v366_v33, %v368_v37  ;;  %v471_v45 = vsel %vm469_vm6, %v468_v34, %v470_v43 }
 0x201   :  { %269 = vmax.xlane.f32.xlu0 %v268_v40  ;;  %170 = vmax.xlane.f32.xlu1 %v169_v41  ;;  %v370_v44 = vsel %vm168_vm2, %v369_v42, -inf  ;;  %v472_v46 = vsel %vm168_vm2, %v471_v45, -inf  ;;  %v610_v41 = vld [vmem:[%s899_s2] ss:$0 sm:$0xff] }
 0x205   :  { %371 = vmax.xlane.f32.xlu1 %v370_v44 }
 0x209   :  { %473 = vmax.xlane.f32.xlu1 %v472_v46 }
 0x217   :  { %384 = vrot.lane.b32.xlu0 %v852_v11, %s785_s10 }
 0x21a   :  { %282 = vrot.lane.b32.xlu1 %v852_v11, %s786_s11 }
 0x28e   :  { %v270_v47 = vpop.xlane.xlu0 %269  ;;  %v171_v48 = vpop.xlane.xlu1 %170 }
 0x28f   :  { %v271_v49 = vsub.f32 %v267_v38, %v270_v47  ;;  %v172_v50 = vsub.f32 %v167_v39, %v171_v48 }
 0x291   :  { %v173_v51 = vmul.f32 1.442695, %v172_v50  ;;  %v272_v52 = vmul.f32 1.442695, %v271_v49 }
 0x292   :  { %v372_v53 = vpop.xlane.xlu1 %371  ;;  %v385_v24 = vpop.permute.xlu0 %384 }
 0x293   :  { %v373_v54 = vsub.f32 %v369_v42, %v372_v53  ;;  %685 = vpow2.f32 %v173_v51 }
 0x294   :  { %687 = vpow2.f32 %v272_v52 }
 0x295   :  { %v374_v55 = vmul.f32 1.442695, %v373_v54 }
 0x296   :  { %v474_v56 = vpop.xlane.xlu1 %473 }
 0x297   :  { %v475_v57 = vsub.f32 %v471_v45, %v474_v56  ;;  %689 = vpow2.f32 %v374_v55 }
 0x299   :  { %v476_v58 = vmul.f32 1.442695, %v475_v57 }
 0x29a   :  { %v283_v4 = vpop.permute.xlu1 %282 }
 0x29b   :  { %691 = vpow2.f32 %v476_v58 }
 0x29d   :  { %v686_v59 = vpop.eup %685 }
 0x29e   :  { %v175_v60 = vsel %vm168_vm2, %v686_v59, 0.0  ;;  %v688_v61 = vpop.eup %687 }
 0x29f   :  { %176 = vadd.xlane.f32.xlu1 %v175_v60  ;;  %v274_v62 = vsel %vm168_vm2, %v688_v61, 0.0 }
 0x2a1   :  { %v690_v63 = vpop.eup %689 }
 0x2a2   :  { %v376_v0 = vsel %vm168_vm2, %v690_v63, 0.0 }
 0x2a3   :  { %275 = vadd.xlane.f32.xlu1 %v274_v62 }
 0x2a5   :  { %v692_v2 = vpop.eup %691 }
 0x2a6   :  { %v478_v3 = vsel %vm168_vm2, %v692_v2, 0.0 }
 0x2a7   :  { %377 = vadd.xlane.f32.xlu1 %v376_v0 }
 0x2ab   :  { %479 = vadd.xlane.f32.xlu1 %v478_v3 }
 0x2bc   :  { %486 = vrot.lane.b32.xlu1 %v852_v11, %s787_s12 }
 0x32c   :  { %v177_v5 = vpop.xlane.xlu1 %176 }
 0x32d   :  { %693 = vrcp.f32 %v177_v5 }
 0x330   :  { %v276_v6 = vpop.xlane.xlu1 %275 }
 0x331   :  { %695 = vrcp.f32 %v276_v6 }
 0x334   :  { %v378_v7 = vpop.xlane.xlu1 %377 }
 0x335   :  { %697 = vrcp.f32 %v378_v7 }
 0x337   :  { %v694_v8 = vpop.eup %693 }
 0x338   :  { %v179_v9 = vmul.f32 %v694_v8, %v177_v5  ;;  %v480_v10 = vpop.xlane.xlu1 %479 }
 0x339   :  { %699 = vrcp.f32 %v480_v10 }
 0x33a   :  { %v180_v12 = vsub.f32 2.0, %v179_v9 }
 0x33b   :  { %v696_v13 = vpop.eup %695 }
 0x33c   :  { %v181_v14 = vmul.f32 %v694_v8, %v180_v12  ;;  %v278_v15 = vmul.f32 %v696_v13, %v276_v6  ;;  %v487_v16 = vpop.permute.xlu1 %486 }
 0x33d   :  { %651 = vmatpush3.msra.mxu0 %v487_v16 }
 0x33e   :  { %v182_v17 = vmul.f32 %v686_v59, %v181_v14  ;;  %v279_v18 = vsub.f32 2.0, %v278_v15 }
 0x33f   :  { %v698_v11 = vpop.eup %697 }
 0x340   :  { %v280_v19 = vmul.f32 %v696_v13, %v279_v18  ;;  %v380_v20 = vmul.f32 %v698_v11, %v378_v7  ;;  %638 = vmatmul.mubr.msk.f32.vlgmr.msra.gmra.mrb[0].mxu1 %vm168_vm2, %v182_v17 }
 0x341   :  { %641 = vmatpush3.msra.mxu1 %v283_v4  ;;  %642 = vmatprep.mubr.msk.f32.mxu1 %vm778_vm0, %v779_v1 }
 0x342   :  { %v281_v21 = vmul.f32 %v688_v61, %v280_v19  ;;  %v381_v22 = vsub.f32 2.0, %v380_v20  ;;  %645 = vmatprep.subr.mxu1 %v779_v1 }
 0x343   :  { %v700_v23 = vpop.eup %699 }
 0x344   :  { %v382_v25 = vmul.f32 %v698_v11, %v381_v22  ;;  %v482_v26 = vmul.f32 %v700_v23, %v480_v10  ;;  %643 = vmatmul.mubr.msk.f32.vlgmr.msra.gmra.mrb[2].mxu1 %vm168_vm2, %v281_v21 }
 0x345   :  { %646 = vmatpush3.msra.mxu1 %v385_v24  ;;  %647 = vmatprep.mubr.msk.f32.mxu1 %vm778_vm0, %v779_v1 }
 0x346   :  { %v383_v27 = vmul.f32 %v690_v63, %v382_v25  ;;  %v483_v28 = vsub.f32 2.0, %v482_v26 }
 0x348   :  { %v484_v29 = vmul.f32 %v700_v23, %v483_v28  ;;  %648 = vmatmul.mubr.msk.f32.vlgmr.msra.gmra.mrb[4].mxu1 %vm168_vm2, %v383_v27 }
 0x34a   :  { %v485_v30 = vmul.f32 %v692_v2, %v484_v29 }
 0x34c   :  { %653 = vmatmul.mubr.msk.f32.vlgmr.msra.gmra.mrb[2].mxu0 %vm168_vm2, %v485_v30 }
 0x413   :  { %v252_v31 = vpop.f32.mrb[0].mxu1 }
 0x414   :  { %v639_v32 = vpop.f32.mrb[1].mxu1 }
 0x417   :  { %v354_v33 = vpop.f32.mrb[2].mxu1 }
 0x418   :  { %563 = vrot.lane.b32.xlu1 %v354_v33, %s788_s13  ;;  %v644_v34 = vpop.f32.mrb[3].mxu1 }
 0x41b   :  { %v456_v35 = vpop.f32.mrb[4].mxu1 }
 0x41c   :  { %567 = vrot.lane.b32.xlu1 %v456_v35, %s789_s14  ;;  %v649_v36 = vpop.f32.mrb[5].mxu1 }
 0x41f   :  { %v558_v37 = vpop.f32.mrb[2].mxu0 }
 0x420   :  { %571 = vrot.lane.b32.xlu1 %v558_v37, %s790_s15  ;;  %v654_v1 = vpop.f32.mrb[3].mxu0 }
 0x48a   :  { %v564_v38 = vpop.permute.xlu1 %563 }
 0x48b   :  { %v575_v40 = vsel %vm574_vm7, %v252_v31, %v564_v38 }
 0x48e   :  { %v568_v39 = vpop.permute.xlu1 %567 }
 0x48f   :  { %v576_v42 = vsel %vm46_vm1, %v575_v40, %v568_v39 }
 0x492   :  { %v572_v43 = vpop.permute.xlu1 %571 }
 0x493   :  { %v578_v44 = vsel %vm577_vm8, %v576_v42, %v572_v43 }
 0x494   :  { %v586_v45 = vadd.f32 %v610_v41, %v578_v44 }
 0x496   :  { %588 = vst.msk [vmem:[#allocation7] sm:$0xff] %vm587_vm9, %v586_v45 }
 0x497   :  { %756 = shalt.err (!%p753_p6)
}
 0x498   :  { %s757_s2 = scalar_lea.hbm %s900_s3, 128 }
 0x499   :  { %p758_p7 = scmp.ne.s32.totalorder %s900_s3, %s757_s2  ;;  %p761_p8 = scmp.lt.u32.totalorder %s757_s2, %s900_s3 }
 0x49b   :  { %p763_p9 = pnand %p761_p8, %p758_p7 }
 0x49d   :  { %766 = shalt.err (!%p763_p9)
}
 0x49e   :  { %598 = dma.vmem_to_hbm [thread:$0]  %s596_s19, 128, %s900_s3, [#allocation4]  }
 0x49f   :  { %771 = dma.done.wait [#allocation4], 128  }
 0x4a0   :  { %772 = vsyncadd [#allocation4], 4294967168 }
 0x4a1   :  { %602 = vsyncpa [#allocation3], 1 }
 0x4a2   :  { %603 = vsyncpa [#allocation6], 1 }
 0x4a3   :  { %604 = vsyncpa [#allocation4], 1 }

</bundles_post_ra>
